<compile_context>
chip_gen: v7x
topology: tpu7x:2x2x1
jax: 0.10.0
libtpu: 0.0.40
codegen_flags: <defaults>
</compile_context>

<pallas_src>
import functools

import jax
import jax.numpy as jnp
from jax.experimental import pallas as pl
from jax.experimental.pallas import tpu as pltpu

EPS = 1e-5  # BatchNorm3d default eps


def _conv_stats_kernel(p_ref, w_ref, b_ref, y_ref, stat_ref, *, m_valid):
    """Per M-tile: conv (single K=27*Cin matmul) + bias, plus partial BN stats."""
    tm = p_ref.shape[0]
    cpad = w_ref.shape[1]

    # One big MXU matmul: all 27 taps folded into the contraction dimension.
    y = jnp.dot(p_ref[...], w_ref[...], preferred_element_type=jnp.float32)
    y = y + b_ref[...]                       # conv bias, broadcast (1, Cpad)
    y_ref[...] = y

    # Partial BatchNorm statistics for this tile (mask padded M rows).
    base = pl.program_id(0) * tm
    row = jax.lax.broadcasted_iota(jnp.int32, (tm, 1), 0) + base
    ym = jnp.where(row < m_valid, y, 0.0)
    s = jnp.sum(ym, axis=0, keepdims=True)                 # (1, Cpad)
    ss = jnp.sum(ym * ym, axis=0, keepdims=True)           # (1, Cpad)
    stat_ref[...] = jnp.concatenate(
        [s, ss, jnp.zeros((6, cpad), jnp.float32)], axis=0)  # (8, Cpad)


def _bn_relu_kernel(y_ref, scale_ref, shift_ref, o_ref):
    """Per M-tile: y * scale + shift, then ReLU (all f32, lane-dense)."""
    z = y_ref[...] * scale_ref[...] + shift_ref[...]
    o_ref[...] = jnp.maximum(z, 0.0).astype(o_ref.dtype)


def convrelu_forward(x, w, bias, gamma, beta, *, matmul_dtype=jnp.bfloat16):
    """Conv3d(k=3, s=1, p=1) + BatchNorm3d(batch stats) + ReLU.

    x     : (N, Cin, D, H, W)   float32  (PyTorch NCDHW)
    w     : (Cout, Cin, 3,3,3)  Conv3d weight (PyTorch layout)
    bias  : (Cout,)
    gamma, beta : (Cout,)       BatchNorm affine parameters
    returns (N, Cout, D, H, W)  float32
    """
    N, Cin, D, H, W = x.shape
    Cout = w.shape[0]
    M = N * D * H * W
    K = 27 * Cin
    CPAD = ((Cout + 127) // 128) * 128        # lane-dense output channels

    # M tiling (kept small enough for v7x's 64 MiB VMEM; ~1 MiB live here).
    if M >= 512:
        TM = 512
    else:
        TM = ((M + 7) // 8) * 8
    MP = ((M + TM - 1) // TM) * TM
    n_tiles = MP // TM

    # ---- im2col glue (JAX): channels-last padded input, 27 taps folded into
    #      the contraction dimension -> (M, 27*Cin), cast to bf16 for the MXU.
    xc = jnp.transpose(x, (0, 2, 3, 4, 1)).astype(matmul_dtype)   # (N,D,H,W,Cin)
    xp = jnp.pad(xc, ((0, 0), (1, 1), (1, 1), (1, 1), (0, 0)))
    taps = []
    for kd in range(3):
        for kh in range(3):
            for kw in range(3):
                taps.append(
                    xp[:, kd:kd + D, kh:kh + H, kw:kw + W, :].reshape(M, Cin))
    patches = jnp.stack(taps, axis=1).reshape(M, K)                # (M, 27*Cin)
    if MP != M:
        patches = jnp.pad(patches, ((0, MP - M), (0, 0)))

    # Weights: (Cout, Cin, kd, kh, kw) -> (27*Cin, Cout) -> pad Cout to 128.
    w2 = jnp.transpose(w, (2, 3, 4, 1, 0)).reshape(K, Cout).astype(matmul_dtype)
    w2 = jnp.pad(w2, ((0, 0), (0, CPAD - Cout)))
    b2 = jnp.pad(bias.astype(jnp.float32), (0, CPAD - Cout)).reshape(1, CPAD)

    # ---- Pass 1: conv matmul + per-tile BN partial stats ----
    kernel1 = functools.partial(_conv_stats_kernel, m_valid=M)
    y, stats = pl.pallas_call(
        kernel1,
        out_shape=(jax.ShapeDtypeStruct((MP, CPAD), jnp.float32),
                   jax.ShapeDtypeStruct((n_tiles * 8, CPAD), jnp.float32)),
        grid_spec=pltpu.PrefetchScalarGridSpec(
            num_scalar_prefetch=0,
            grid=(n_tiles,),
            in_specs=[
                pl.BlockSpec((TM, K), lambda i: (i, 0)),      # patch stream
                pl.BlockSpec((K, CPAD), lambda i: (0, 0)),    # resident weights
                pl.BlockSpec((1, CPAD), lambda i: (0, 0)),    # resident bias
            ],
            out_specs=[
                pl.BlockSpec((TM, CPAD), lambda i: (i, 0)),   # conv output y
                pl.BlockSpec((8, CPAD), lambda i: (i, 0)),    # per-tile stats
            ],
        ),
        compiler_params=pltpu.CompilerParams(
            dimension_semantics=("parallel",)),
    )(patches, w2, b2)

    # ---- Tiny global BN finalize (Cout-sized) in plain JAX ----
    st = stats.reshape(n_tiles, 8, CPAD)
    total = jnp.sum(st[:, 0, :], axis=0)
    total_sq = jnp.sum(st[:, 1, :], axis=0)
    mean = total / M
    var = jnp.maximum(total_sq / M - mean * mean, 0.0)   # biased variance
    g2 = jnp.pad(gamma.astype(jnp.float32), (0, CPAD - Cout))
    be2 = jnp.pad(beta.astype(jnp.float32), (0, CPAD - Cout))
    scale_v = g2 * jax.lax.rsqrt(var + EPS)
    shift_v = be2 - mean * scale_v
    scale2 = scale_v.reshape(1, CPAD)
    shift2 = shift_v.reshape(1, CPAD)

    # ---- Pass 2: tiled normalize + affine + ReLU ----
    out = pl.pallas_call(
        _bn_relu_kernel,
        out_shape=jax.ShapeDtypeStruct((MP, CPAD), jnp.float32),
        grid_spec=pltpu.PrefetchScalarGridSpec(
            num_scalar_prefetch=0,
            grid=(n_tiles,),
            in_specs=[
                pl.BlockSpec((TM, CPAD), lambda i: (i, 0)),
                pl.BlockSpec((1, CPAD), lambda i: (0, 0)),
                pl.BlockSpec((1, CPAD), lambda i: (0, 0)),
            ],
            out_specs=pl.BlockSpec((TM, CPAD), lambda i: (i, 0)),
        ),
        compiler_params=pltpu.CompilerParams(
            dimension_semantics=("parallel",)),
    )(y, scale2, shift2)

    out = out[:M, :Cout].reshape(N, D, H, W, Cout)
    return jnp.transpose(out, (0, 4, 1, 2, 3))                # back to NCDHW


def reference_forward(x, w, bias, gamma, beta, *, matmul_dtype=jnp.bfloat16):
    """Pure-JAX reference (same bf16 input rounding, f32 accumulation)."""
    Cout = w.shape[0]
    y = jax.lax.conv_general_dilated(
        x.astype(matmul_dtype), w.astype(matmul_dtype),
        window_strides=(1, 1, 1), padding=[(1, 1)] * 3,
        dimension_numbers=("NCDHW", "OIDHW", "NCDHW"),
        preferred_element_type=jnp.float32)
    y = y + bias.reshape(1, Cout, 1, 1, 1)
    mean = jnp.mean(y, axis=(0, 2, 3, 4), keepdims=True)
    var = jnp.mean(jnp.square(y - mean), axis=(0, 2, 3, 4), keepdims=True)
    y = (y - mean) * jax.lax.rsqrt(var + EPS)
    y = y * gamma.reshape(1, Cout, 1, 1, 1) + beta.reshape(1, Cout, 1, 1, 1)
    return jnp.maximum(y, 0.0)


if __name__ == "__main__":
    key = jax.random.PRNGKey(0)
    kx, kw, kb, kg, kbe = jax.random.split(key, 5)
    N, Cin, Cout, D, H, W = 2, 4, 8, 8, 8, 8

    x = jax.random.normal(kx, (N, Cin, D, H, W), jnp.float32)
    w = 0.1 * jax.random.normal(kw, (Cout, Cin, 3, 3, 3), jnp.float32)
    bias = 0.1 * jax.random.normal(kb, (Cout,), jnp.float32)
    gamma = 1.0 + 0.1 * jax.random.normal(kg, (Cout,), jnp.float32)
    beta = 0.1 * jax.random.normal(kbe, (Cout,), jnp.float32)

    out = convrelu_forward(x, w, bias, gamma, beta)
    out = jax.block_until_ready(out)
    assert out.shape == (N, Cout, D, H, W), out.shape

    ref = reference_forward(x, w, bias, gamma, beta)
    max_err = float(jnp.max(jnp.abs(out - ref)))
    assert jnp.allclose(out, ref, rtol=2e-3, atol=2e-3), f"max_err={max_err}"

    print("KERNEL_OK")
</pallas_src>

<mosaic_0001>
module attributes {stable_mosaic.version = 11 : i64} {
  func.func @_conv_stats_kernel(%arg0: i32, %arg1: memref<512x108xbf16, #tpu.memory_space<vmem>>, %arg2: memref<108x128xbf16, #tpu.memory_space<vmem>>, %arg3: memref<1x128xf32, #tpu.memory_space<vmem>>, %arg4: memref<512x128xf32, #tpu.memory_space<vmem>>, %arg5: memref<8x128xf32, #tpu.memory_space<vmem>>) attributes {dimension_semantics = [#tpu.dimension_semantics<parallel>], iteration_bounds = array<i64: 2>, scalar_prefetch = 0 : i64, scratch_operands = 0 : i64, tpu.core_type = #tpu.core_type<tc>, window_params = [{transform_indices = @transform_0, window_bounds = array<i64: 512, 108>}, {pipeline_mode = #tpu.pipeline_mode<synchronous>, transform_indices = @transform_1, window_bounds = array<i64: 108, 128>}, {pipeline_mode = #tpu.pipeline_mode<synchronous>, transform_indices = @transform_2, window_bounds = array<i64: 1, 128>}, {transform_indices = @transform_3, window_bounds = array<i64: 512, 128>}, {transform_indices = @transform_4, window_bounds = array<i64: 8, 128>}]} {
    %c0 = arith.constant 0 : index
    %c0_0 = arith.constant 0 : index
    %0 = vector.load %arg1[%c0, %c0_0] : memref<512x108xbf16, #tpu.memory_space<vmem>>, vector<512x108xbf16>
    %c0_1 = arith.constant 0 : index
    %c0_2 = arith.constant 0 : index
    %1 = vector.load %arg2[%c0_1, %c0_2] : memref<108x128xbf16, #tpu.memory_space<vmem>>, vector<108x128xbf16>
    %cst = arith.constant dense<0.000000e+00> : vector<512x128xf32>
    %2 = tpu.matmul %0, %1, %cst {dimension_numbers = #tpu.dot_dimension_numbers<[1], [0], [0], [1], [0, 0, 1, 1], [], []>} : vector<512x108xbf16>, vector<108x128xbf16>, vector<512x128xf32> -> vector<512x128xf32>
    %c0_3 = arith.constant 0 : index
    %c0_4 = arith.constant 0 : index
    %3 = vector.load %arg3[%c0_3, %c0_4] : memref<1x128xf32, #tpu.memory_space<vmem>>, vector<1x128xf32>
    %4 = vector.broadcast %3 : vector<1x128xf32> to vector<512x128xf32>
    %5 = arith.addf %2, %4 : vector<512x128xf32>
    %c0_5 = arith.constant 0 : index
    %c0_6 = arith.constant 0 : index
    %6 = vector.load %arg4[%c0_5, %c0_6] : memref<512x128xf32, #tpu.memory_space<vmem>>, vector<512x128xf32>
    tpu.vector_store %arg4[%c0_5, %c0_6], %5 {strides = array<i32>} : memref<512x128xf32, #tpu.memory_space<vmem>>, vector<512x128xf32>,
    %c512_i32 = arith.constant 512 : i32
    %7 = arith.muli %arg0, %c512_i32 : i32
    %8 = tpu.iota {dimensions = array<i32: 0>} : vector<512x1xi32>
    %9 = vector.broadcast %7 : i32 to vector<512x1xi32>
    %10 = arith.addi %8, %9 : vector<512x1xi32>
    %c1024_i32 = arith.constant 1024 : i32
    %11 = vector.broadcast %c1024_i32 : i32 to vector<512x1xi32>
    %12 = arith.cmpi slt, %10, %11 : vector<512x1xi32>
    %cst_7 = arith.constant 0.000000e+00 : f32
    %13 = vector.shape_cast %12 : vector<512x1xi1> to vector<512x1xi1>
    %14 = vector.broadcast %13 : vector<512x1xi1> to vector<512x128xi1>
    %15 = vector.broadcast %cst_7 : f32 to vector<512x128xf32>
    %16 = arith.select %14, %5, %15 : vector<512x128xi1>, vector<512x128xf32>
    %cst_8 = arith.constant dense<0.000000e+00> : vector<128xf32>
    %17 = vector.multi_reduction <add>, %16, %cst_8 [0] : vector<512x128xf32> to vector<128xf32>
    %18 = vector.shape_cast %17 : vector<128xf32> to vector<1x128xf32>
    %19 = arith.mulf %16, %16 : vector<512x128xf32>
    %cst_9 = arith.constant dense<0.000000e+00> : vector<128xf32>
    %20 = vector.multi_reduction <add>, %19, %cst_9 [0] : vector<512x128xf32> to vector<128xf32>
    %21 = vector.shape_cast %20 : vector<128xf32> to vector<1x128xf32>
    %cst_10 = arith.constant 0.000000e+00 : f32
    %22 = vector.broadcast %cst_10 : f32 to vector<6x128xf32>
    %23 = tpu.concatenate %18, %21, %22 in 0 : vector<1x128xf32>, vector<1x128xf32>, vector<6x128xf32> -> vector<8x128xf32>
    %c0_11 = arith.constant 0 : index
    %c0_12 = arith.constant 0 : index
    %24 = vector.load %arg5[%c0_11, %c0_12] : memref<8x128xf32, #tpu.memory_space<vmem>>, vector<8x128xf32>
    tpu.vector_store %arg5[%c0_11, %c0_12], %23 {strides = array<i32>} : memref<8x128xf32, #tpu.memory_space<vmem>>, vector<8x128xf32>,
    return
  }
  func.func @transform_0(%arg0: i32) -> (i32, i32) {
    %c0_i32 = arith.constant 0 : i32
    %c0_i32_0 = arith.constant 0 : i32
    return %arg0, %c0_i32 : i32, i32
  }
  func.func @transform_1(%arg0: i32) -> (i32, i32) {
    %c0_i32 = arith.constant 0 : i32
    %c0_i32_0 = arith.constant 0 : i32
    %c0_i32_1 = arith.constant 0 : i32
    return %c0_i32, %c0_i32_0 : i32, i32
  }
  func.func @transform_2(%arg0: i32) -> (i32, i32) {
    %c0_i32 = arith.constant 0 : i32
    %c0_i32_0 = arith.constant 0 : i32
    %c0_i32_1 = arith.constant 0 : i32
    return %c0_i32, %c0_i32_0 : i32, i32
  }
  func.func @transform_3(%arg0: i32) -> (i32, i32) {
    %c0_i32 = arith.constant 0 : i32
    %c0_i32_0 = arith.constant 0 : i32
    return %arg0, %c0_i32 : i32, i32
  }
  func.func @transform_4(%arg0: i32) -> (i32, i32) {
    %c0_i32 = arith.constant 0 : i32
    %c0_i32_0 = arith.constant 0 : i32
    return %arg0, %c0_i32 : i32, i32
  }
}

</mosaic_0001>

<bundles_post_ra>
// kernel: tpu_custom_call.1
= control target key start
LH: loop header
LB: loop body
LE: loop exit
PB: predicated region body
PF: predicated region fallthrough
CT: control target
= control target key end

     0   :  { %10 = vsyncpa [#allocation3], 0  ;;  %s2882_s0 = inlined_call_operand.vmem [shape: bf16[1024,108], index: 0, kind: input, shape index: {}]   ;;  %s2883_s1 = inlined_call_operand.vmem [shape: bf16[108,128], index: 1, kind: input, shape index: {}]   ;;  %s2884_s2 = inlined_call_operand.vmem [shape: f32[1,128], index: 2, kind: input, shape index: {}]   ;;  %s2885_s3 = inlined_call_operand.hbm [shape: f32[1024,128], index: 3, kind: output, shape index: {0}]   ;;  %s2886_s4 = inlined_call_operand.hbm [shape: f32[16,128], index: 4, kind: output, shape index: {1}]  }
   0x1   :  { %12 = vsyncpa [#allocation3 + $0x1], 0 }
   0x2   :  { %13 = vsyncpa [#allocation5], 0 }
   0x3   :  { %15 = vsyncpa [#allocation5 + $0x1], 0  ;;  %s2103_s15 = smov 0   ;;  %s2105_s16 = smov 0  }
   0x4   :  { %s2107_s17 = smov 0   ;;  %s2109_s18 = smov 0  }
   0x5 LB: > { %s2124_s19 = sadd.s32 4294967295, %s2072_s18   ;;  %s1671_s20 = sadd.s32 4294967294, %s2072_s18   ;;  %s2072_s18 = sphi %s2109_s18, %s2892_s18   ;;  %s2068_s17 = sphi %s2107_s17, %s2891_s17   ;;  %s2064_s16 = sphi %s2105_s16, %s2890_s16   ;;  %s2060_s15 = sphi %s2103_s15, %s2889_s15  }
   0x6   : > { %s2128_s21 = sadd.s32 1, %s2072_s18   ;;  %s96_s22 = sadd.s32 1, %s2068_s17 }
   0x7   : > { %s93_s23 = ssub.s32 %s2072_s18, %s2128_s21  ;;  %p106_p0 = scmp.ne.s32.totalorder %s2068_s17, %s2064_s16 }
   0x8   : > { %p94_p1 = scmp.eq.s32.totalorder %s93_s23, 0  ;;  %p107_p2 = scmp.eq.s32.totalorder %s2124_s19, 1 }
   0x9   : > { %p112_p3 = scmp.ne.s32.totalorder %s2064_s16, %s2060_s15  ;;  %p113_p4 = scmp.eq.s32.totalorder %s1671_s20, 1 }
   0xa   : > { %s2139_s24 = scalar_select %p94_p1, %s2068_s17, %s96_s22  }
   0xb   : > { %p2141_p5 = por %p107_p2, %p106_p0  ;;  %p2145_p6 = por %p113_p4, %p112_p3 }
   0xc   : > { %p1674_p7 = scmp.ge.s32.totalorder %s2072_s18, 1  ;;  %p172_p8 = scmp.lt.s32.totalorder %s2072_s18, 3 }
   0xe   : > { %p173_p9 = pnand %p1674_p7, %p172_p8 }
   0xf   : > { %v1939_v0 = vld [vmem:[%s2883_s1] sm:$0xff] (!%p173_p9)   ;;  %v1940_v1 = vld [vmem:[%s2883_s1 + $0x8] sm:$0xff] (!%p173_p9)   ;;  %s1677_s5 = sshll.u32 (!%p173_p9), %s2124_s19, 6  ;;  %v1941_v2 = vld [vmem:[%s2883_s1 + $0x10] sm:$0xff] (!%p173_p9)   ;;  %vm497_vm0 = vcmask (!%p173_p9), 883712   ;;  %vm594_vm1 = vcmask (!%p173_p9), 1045504   ;;  %v952_v40 = vlaneseq (!%p173_p9) }
  0x10   : > { %176 = sbr.rel (%p173_p9) target bundleno = 429 (0x1ad), region = 32  ;;  %1799 = vmatprep.subr.bf16.mxu0 (!%p173_p9), %v1939_v0  ;;  %p204_p10 = scmp.lt.s32.totalorder (!%p173_p9), %s1677_s5, 127  ;;  %1877 = vmatprep.subr.bf16.mxu1 (!%p173_p9), %v1939_v0  ;;  %v1942_v3 = vld [vmem:[%s2883_s1 + $0x18] sm:$0xff] (!%p173_p9)   ;;  %v1943_v5 = vld [vmem:[%s2883_s1 + $0x20] sm:$0xff] (!%p173_p9)   ;;  %v1944_v6 = vld [vmem:[%s2883_s1 + $0x28] sm:$0xff] (!%p173_p9)  }
  0x11   : > { %1800 = vmatpush3.bf16.msra.mxu0 (!%p173_p9), %v1939_v0  ;;  %1884 = vmatpush3.bf16.msra.mxu1 (!%p173_p9), %v1939_v0  ;;  %v1945_v7 = vld [vmem:[%s2883_s1 + $0x30] sm:$0x3f] (!%p173_p9)   ;;  %v2242_v41 = vshrl.u32 (!%p173_p9), %v952_v40, 7  ;;  %s1751_s29 = sshll.u32 (!%p173_p9), %s2124_s19, 9  ;;  %s2249_s30 = sand.u32 (!%p173_p9), 1, %s2064_s16  }
  0x12   : > { %1801 = vmatprep.subr.bf16.mxu0 (!%p173_p9), %v1940_v1  ;;  %1878 = vmatprep.subr.bf16.mxu1 (!%p173_p9), %v1940_v1  ;;  %v596_v8 = vsel (!%p173_p9), %vm594_vm1, %v1945_v7, 0  ;;  %v2246_v43 = vstv (!%p173_p9), %s1751_s29  ;;  %v2264_v52 = vld [vmem:[%s2884_s2] ss:$0 sm:$0xff] (!%p173_p9)  ;;  %s1759_s9 = sshll.u32 (!%p173_p9), %s2124_s19, 13  ;;  %s1546_s14 = scalar_lea.sflag (!%p173_p9), [#allocation3], %s2249_s30 }
  0x13   : > { %v955_v42 = vadd.s32 (!%p173_p9), 16, %v2242_v41  ;;  %v956_v44 = vadd.s32 (!%p173_p9), 24, %v2242_v41  ;;  %v954_v45 = vadd.s32 (!%p173_p9), 8, %v2242_v41  ;;  %v959_v46 = vadd.s32 (!%p173_p9), 48, %v2242_v41  ;;  %s2074_s22 = smov (!%p173_p9), [#allocation2]  }
  0x14   : > { %v957_v47 = vadd.s32 (!%p173_p9), 32, %v2242_v41  ;;  %v1018_v49 = vadd.s32 (!%p173_p9), %v2246_v43, %v2242_v41  ;;  %v960_v50 = vadd.s32 (!%p173_p9), 56, %v2242_v41  ;;  %v958_v51 = vadd.s32 (!%p173_p9), 40, %v2242_v41  ;;  %s1982_s23 = sshll.u32 (!%p173_p9), %s2074_s22, 4  ;;  %s1983_s23 = int_to_ptr.vmem [resolvable:$false] %s1982_s23 }
  0x15   : > { %1802 = vmatpush3.bf16.msra.mxu0 (!%p173_p9), %v1940_v1  ;;  %1885 = vmatpush3.bf16.msra.mxu1 (!%p173_p9), %v1940_v1  ;;  %v1020_v48 = vadd.s32 (!%p173_p9), %v2246_v43, %v955_v42  ;;  %v1021_v53 = vadd.s32 (!%p173_p9), %v2246_v43, %v956_v44  ;;  %v1019_v54 = vadd.s32 (!%p173_p9), %v2246_v43, %v954_v45  ;;  %v963_v62 = vadd.s32 (!%p173_p9), 80, %v2242_v41  ;;  %s1984_s27 = scalar_lea.vmem (!%p173_p9), %s1983_s23, 16384 }
  0x16   : > { %1803 = vmatprep.subr.bf16.mxu0 (!%p173_p9), %v1941_v2  ;;  %1879 = vmatprep.subr.bf16.mxu1 (!%p173_p9), %v1941_v2  ;;  %v2269_v55 = vadd.s32 (!%p173_p9), %v2246_v43, %v959_v46  ;;  %v2272_v56 = vadd.s32 (!%p173_p9), %v2246_v43, %v957_v47  ;;  %vm1082_vm3 = vcmp.lt.s32.totalorder (!%p173_p9), %v1018_v49, 1024  ;;  %v2275_v58 = vadd.s32 (!%p173_p9), %v2246_v43, %v960_v50 }
  0x17   : > { %s2894_s5 = smov (!%p204_p10, %s1677_s5), 127  ;;  %vm1084_vm2 = vcmp.lt.s32.totalorder %v1020_v48, 1024  ;;  %v2278_v59 = vadd.s32 %v2246_v43, %v958_v51  ;;  %v961_v63 = vadd.s32 64, %v2242_v41  ;;  %v962_v0 = vadd.s32 72, %v2242_v41 }
  0x18   : > { %s1678_s8 = sshll.u32 %s2894_s5, 2  ;;  %s1675_s5 = sshll.u32 %s2249_s30, 9  ;;  %vm1085_vm4 = vcmp.lt.s32.totalorder %v1021_v53, 1024  ;;  %vm1083_vm5 = vcmp.lt.s32.totalorder %v1019_v54, 1024  ;;  %vm1088_vm6 = vcmp.lt.s32.totalorder %v2269_v55, 1024  ;;  %vm1086_vm7 = vcmp.lt.s32.totalorder %v2272_v56, 1024 }
  0x19   : > { %s2167_s13 = scalar_lea.vmem %s2882_s0, %s1678_s8  ;;  %1804 = vmatpush3.bf16.msra.mxu0 %v1941_v2  ;;  %1886 = vmatpush3.bf16.msra.mxu1 %v1941_v2  ;;  %s2288_s8 = scalar_lea.vmem [#allocation2], %s1675_s5  ;;  %vm1087_vm8 = vcmp.lt.s32.totalorder %v2278_v59, 1024  ;;  %vm1089_vm9 = vcmp.lt.s32.totalorder %v2275_v58, 1024  ;;  %v971_v56 = vadd.s32 144, %v2242_v41  ;;  %v970_v55 = vadd.s32 136, %v2242_v41 }
  0x1a   : > { %v1946_v4 = vld [vmem:[%s2167_s13] sm:$0xff]   ;;  %1805 = vmatprep.subr.bf16.mxu0 %v1942_v3  ;;  %1880 = vmatprep.subr.bf16.mxu1 %v1942_v3  ;;  %v1947_v9 = vld [vmem:[%s2167_s13 + $0x8] sm:$0xff]   ;;  %v1948_v11 = vld [vmem:[%s2167_s13 + $0x10] sm:$0xff]   ;;  %s1564_s10 = sshll.u32 %s2288_s8, 4  ;;  %s2704_s10 = int_to_ptr.vmem [resolvable:$true] %s1564_s10 }
  0x1b   : > { %1813 = vmatprep.mubr.msk.bf16.mxu0 %vm497_vm0, %v1946_v4  ;;  %v1962_v10 = vld [vmem:[%s2167_s13 + $0x80] sm:$0xff]   ;;  %v1963_v12 = vld [vmem:[%s2167_s13 + $0x88] sm:$0xff]   ;;  %v1964_v13 = vld [vmem:[%s2167_s13 + $0x90] sm:$0xff]   ;;  %s1978_s20 = scalar_lea.vmem %s2704_s10, 8192  ;;  %p1985_p0 = scmp.lt.s32.totalorder %s2704_s10, %s1983_s23 }
  0x1c   : > { %1845 = vmatprep.mubr.msk.bf16.mxu1 %vm497_vm0, %v1962_v10  ;;  %v1949_v14 = vld [vmem:[%s2167_s13 + $0x18] sm:$0xff]   ;;  %v1950_v15 = vld [vmem:[%s2167_s13 + $0x20] sm:$0xff]   ;;  %v1951_v18 = vld [vmem:[%s2167_s13 + $0x28] sm:$0xff]   ;;  %p1979_p11 = scmp.ne.s32.totalorder %s2704_s10, %s1978_s20  ;;  %p1986_p1 = scmp.lt.s32.totalorder %s1984_s27, %s1978_s20 }
  0x1d   : > { %1806 = vmatpush3.bf16.msra.mxu0 %v1942_v3  ;;  %1887 = vmatpush3.bf16.msra.mxu1 %v1942_v3  ;;  %v1965_v16 = vld [vmem:[%s2167_s13 + $0x98] sm:$0xff]   ;;  %v1966_v17 = vld [vmem:[%s2167_s13 + $0xa0] sm:$0xff]   ;;  %v1952_v19 = vld [vmem:[%s2167_s13 + $0x30] sm:$0xff]  }
  0x1e   : > { %1807 = vmatprep.subr.bf16.mxu0 %v1943_v5  ;;  %1881 = vmatprep.subr.bf16.mxu1 %v1943_v5  ;;  %v1967_v20 = vld [vmem:[%s2167_s13 + $0xa8] sm:$0xff]   ;;  %v1968_v21 = vld [vmem:[%s2167_s13 + $0xb0] sm:$0xff]   ;;  %v1953_v22 = vld [vmem:[%s2167_s13 + $0x38] sm:$0xff]   ;;  %p1980_p12 = pnand %p1979_p11, %p2141_p5  ;;  %p1987_p2 = por %p1986_p1, %p1985_p0 }
  0x1f   : > { %v1954_v23 = vld [vmem:[%s2167_s13 + $0x40] sm:$0xff]   ;;  %v1969_v24 = vld [vmem:[%s2167_s13 + $0xb8] sm:$0xff]   ;;  %v1955_v26 = vld [vmem:[%s2167_s13 + $0x48] sm:$0xff]  }
  0x20   : > { %v1970_v25 = vld [vmem:[%s2167_s13 + $0xc0] sm:$0xff]   ;;  %v1956_v27 = vld [vmem:[%s2167_s13 + $0x50] sm:$0xff]   ;;  %v1971_v28 = vld [vmem:[%s2167_s13 + $0xc8] sm:$0xff]   ;;  %p1981_p13 = pneg %p1980_p12 }
  0x21   : > { %1808 = vmatpush3.bf16.msra.mxu0 %v1943_v5  ;;  %1888 = vmatpush3.bf16.msra.mxu1 %v1943_v5  ;;  %v1972_v29 = vld [vmem:[%s2167_s13 + $0xd0] sm:$0xff]   ;;  %v1957_v30 = vld [vmem:[%s2167_s13 + $0x58] sm:$0xff]   ;;  %v1958_v31 = vld [vmem:[%s2167_s13 + $0x60] sm:$0xff]  }
  0x22   : > { %1809 = vmatprep.subr.bf16.mxu0 %v1944_v6  ;;  %1882 = vmatprep.subr.bf16.mxu1 %v1944_v6  ;;  %v1973_v32 = vld [vmem:[%s2167_s13 + $0xd8] sm:$0xff]   ;;  %v1974_v33 = vld [vmem:[%s2167_s13 + $0xe0] sm:$0xff]   ;;  %v1959_v34 = vld [vmem:[%s2167_s13 + $0x68] sm:$0xff]   ;;  %p1988_p3 = pnand %p1987_p2, %p1981_p13 }
  0x23   : > { %v1960_v35 = vld [vmem:[%s2167_s13 + $0x70] sm:$0xff]   ;;  %v1975_v36 = vld [vmem:[%s2167_s13 + $0xe8] sm:$0xff]   ;;  %v1961_v38 = vld [vmem:[%s2167_s13 + $0x78] sm:$0xff]  }
  0x24   : > { %v1976_v37 = vld [vmem:[%s2167_s13 + $0xf0] sm:$0xff]   ;;  %v1977_v39 = vld [vmem:[%s2167_s13 + $0xf8] sm:$0xff]   ;;  %s2702_s13 = scalar_lea.hbm %s2885_s3, %s1759_s9 }
  0x25   : > { %1810 = vmatpush3.bf16.msra.mxu0 %v1944_v6  ;;  %1889 = vmatpush3.bf16.msra.mxu1 %v1944_v6 }
  0x26   : > { %1891 = vmatprep.subr.msk.bf16.mxu0 %vm594_vm1, %v1945_v7  ;;  %1892 = vmatprep.subr.msk.bf16.mxu1 %vm594_vm1, %v1945_v7 }
  0x29   : > { %1812 = vmatpush3.bf16.msra.mxu0 %v596_v8  ;;  %1890 = vmatpush3.bf16.msra.mxu1 %v596_v8 }
  0x2c   : > { %1814 = vmatmul.mubr.msk.bf16.vlgmr.msra.gmra.mrb[0].mxu0 %vm497_vm0, %v1947_v9  ;;  %1846 = vmatmul.mubr.msk.bf16.vlgmr.msra.gmra.mrb[0].mxu1 %vm497_vm0, %v1963_v12  ;;  %v964_v12 = vadd.s32 88, %v2242_v41 }
  0x2d   : > { %1817 = vmatprep.mubr.msk.bf16.mxu0 %vm497_vm0, %v1948_v11  ;;  %1849 = vmatprep.mubr.msk.bf16.mxu1 %vm497_vm0, %v1964_v13 }
  0x34   : > { %1818 = vmatmul.mubr.msk.bf16.gmra.mrb[4].mxu0 %vm497_vm0, %v1949_v14  ;;  %1850 = vmatmul.mubr.msk.bf16.gmra.mrb[4].mxu1 %vm497_vm0, %v1965_v16  ;;  %v2307_v14 = vadd.s32 %v2246_v43, %v963_v62  ;;  %v2313_v16 = vadd.s32 %v2246_v43, %v962_v0 }
  0x35   : > { %1821 = vmatprep.mubr.msk.bf16.mxu0 %vm497_vm0, %v1950_v15  ;;  %1853 = vmatprep.mubr.msk.bf16.mxu1 %vm497_vm0, %v1966_v17  ;;  %v2310_v15 = vadd.s32 %v2246_v43, %v961_v63  ;;  %v967_v17 = vadd.s32 112, %v2242_v41 }
  0x36   : > { %vm1092_vm11 = vcmp.lt.s32.totalorder %v2307_v14, 1024  ;;  %vm1091_vm12 = vcmp.lt.s32.totalorder %v2313_v16, 1024 }
  0x37   : > { %vm1090_vm10 = vcmp.lt.s32.totalorder %v2310_v15, 1024  ;;  %v975_v15 = vadd.s32 176, %v2242_v41 }
  0x3c   : > { %1822 = vmatmul.mubr.msk.bf16.gmra.mrb[8].mxu0 %vm497_vm0, %v1951_v18  ;;  %1854 = vmatmul.mubr.msk.bf16.gmra.mrb[8].mxu1 %vm497_vm0, %v1967_v20  ;;  %v965_v20 = vadd.s32 96, %v2242_v41 }
  0x3d   : > { %1825 = vmatprep.mubr.msk.bf16.mxu0 %vm497_vm0, %v1952_v19  ;;  %1857 = vmatprep.mubr.msk.bf16.mxu1 %vm497_vm0, %v1968_v21 }
  0x3e   : > { %v2345_v40 = vadd.s32 %v2246_v43, %v965_v20 }
  0x40   : > { %vm1094_vm14 = vcmp.lt.s32.totalorder %v2345_v40, 1024 }
  0x44   : > { %1826 = vmatmul.mubr.msk.bf16.gmra.mrb[12].mxu0 %vm497_vm0, %v1953_v22  ;;  %1858 = vmatmul.mubr.msk.bf16.gmra.mrb[12].mxu1 %vm497_vm0, %v1969_v24 }
  0x45   : > { %1829 = vmatprep.mubr.msk.bf16.mxu0 %vm497_vm0, %v1954_v23  ;;  %1861 = vmatprep.mubr.msk.bf16.mxu1 %vm497_vm0, %v1970_v25 }
  0x4c   : > { %1830 = vmatmul.mubr.msk.bf16.gmra.mrb[16].mxu0 %vm497_vm0, %v1955_v26  ;;  %1862 = vmatmul.mubr.msk.bf16.gmra.mrb[16].mxu1 %vm497_vm0, %v1971_v28  ;;  %v2330_v28 = vadd.s32 %v2246_v43, %v964_v12 }
  0x4d   : > { %1833 = vmatprep.mubr.msk.bf16.mxu0 %vm497_vm0, %v1956_v27  ;;  %1865 = vmatprep.mubr.msk.bf16.mxu1 %vm497_vm0, %v1972_v29  ;;  %v968_v29 = vadd.s32 120, %v2242_v41 }
  0x4e   : > { %vm1093_vm13 = vcmp.lt.s32.totalorder %v2330_v28, 1024 }
  0x4f   : > { %v2359_v54 = vadd.s32 %v2246_v43, %v968_v29 }
  0x51   : > { %vm1097_vm1 = vcmp.lt.s32.totalorder %v2359_v54, 1024 }
  0x54   : > { %1834 = vmatmul.mubr.msk.bf16.gmra.mrb[20].mxu0 %vm497_vm0, %v1957_v30  ;;  %1866 = vmatmul.mubr.msk.bf16.gmra.mrb[20].mxu1 %vm497_vm0, %v1973_v32  ;;  %v966_v30 = vadd.s32 104, %v2242_v41 }
  0x55   : > { %1837 = vmatprep.mubr.msk.bf16.mxu0 %vm497_vm0, %v1958_v31  ;;  %1869 = vmatprep.mubr.msk.bf16.mxu1 %vm497_vm0, %v1974_v33 }
  0x5c   : > { %1838 = vmatmul.mubr.msk.bf16.gmra.mrb[24].mxu0 %vm497_vm0, %v1959_v34  ;;  %1870 = vmatmul.mubr.msk.bf16.gmra.mrb[24].mxu1 %vm497_vm0, %v1975_v36 }
  0x5d   : > { %1841 = vmatprep.mubr.msk.bf16.mxu0 %vm497_vm0, %v1960_v35  ;;  %1873 = vmatprep.mubr.msk.bf16.mxu1 %vm497_vm0, %v1976_v37 }
  0x64   : > { %1842 = vmatmul.mubr.msk.bf16.gmra.mrb[28].mxu0 %vm497_vm0, %v1961_v38  ;;  %1874 = vmatmul.mubr.msk.bf16.gmra.mrb[28].mxu1 %vm497_vm0, %v1977_v39  ;;  %v2342_v39 = vadd.s32 %v2246_v43, %v967_v17 }
  0x66   : > { %vm1096_vm15 = vcmp.lt.s32.totalorder %v2342_v39, 1024 }
  0xff   : > { %v1815_v57 = vpop.f32.mrb[0].mxu0  ;;  %v1847_v1 = vpop.f32.mrb[0].mxu1 }
 0x100   : > { %v641_v60 = vadd.f32 %v1815_v57, %v2264_v52  ;;  %v632_v61 = vpop.f32.mrb[1].mxu0  ;;  %v2286_v4 = vadd.f32 %v1847_v1, %v2264_v52  ;;  %v760_v5 = vpop.f32.mrb[1].mxu1  ;;  %v2362_v57 = vadd.s32 %v2246_v43, %v966_v30 }
 0x101   : > { %v633_v2 = vadd.f32 %v2264_v52, %v632_v61  ;;  %v1816_v3 = vpop.f32.mrb[2].mxu0  ;;  %v2295_v8 = vadd.f32 %v2264_v52, %v760_v5  ;;  %v1848_v9 = vpop.f32.mrb[2].mxu1 }
 0x102   : > { %889 = vst [vmem:[%s2288_s8 + $0x10] sm:$0xff] %v641_v60  ;;  %v644_v6 = vadd.f32 %v1816_v3, %v2264_v52  ;;  %v635_v7 = vpop.f32.mrb[3].mxu0  ;;  %921 = vst [vmem:[%s2288_s8 + $0x110] sm:$0xff] %v2286_v4  ;;  %v763_v13 = vpop.f32.mrb[3].mxu1  ;;  %v1276_v18 = vsel %vm1084_vm2, %v641_v60, 0.0  ;;  %v2323_v21 = vadd.f32 %v1848_v9, %v2264_v52  ;;  %v972_v9 = vadd.s32 152, %v2242_v41 }
 0x103   : > { %887 = vst [vmem:[%s2288_s8] sm:$0xff] %v633_v2  ;;  %v1274_v10 = vsel %vm1082_vm3, %v633_v2, 0.0  ;;  %v636_v11 = vadd.f32 %v2264_v52, %v635_v7  ;;  %919 = vst [vmem:[%s2288_s8 + $0x100] sm:$0xff] %v2295_v8  ;;  %v2326_v25 = vadd.f32 %v2264_v52, %v763_v13  ;;  %v1409_v31 = vmul.f32 %v1276_v18, %v1276_v18 }
 0x104   : > { %890 = vst [vmem:[%s2288_s8 + $0x18] sm:$0xff] %v644_v6  ;;  %v1407_v22 = vmul.f32 %v1274_v10, %v1274_v10  ;;  %v1277_v26 = vsel %vm1085_vm4, %v644_v6, 0.0  ;;  %922 = vst [vmem:[%s2288_s8 + $0x118] sm:$0xff] %v2323_v21  ;;  %v969_v2 = vadd.s32 128, %v2242_v41  ;;  %vm1095_vm0 = vcmp.lt.s32.totalorder %v2362_v57, 1024 }
 0x105   : > { %888 = vst [vmem:[%s2288_s8 + $0x8] sm:$0xff] %v636_v11  ;;  %v1275_v19 = vsel %vm1083_vm5, %v636_v11, 0.0  ;;  %920 = vst [vmem:[%s2288_s8 + $0x108] sm:$0xff] %v2326_v25  ;;  %v1410_v45 = vmul.f32 %v1277_v26, %v1277_v26 }
 0x106   : > { %v1338_v23 = vadd.f32 %v1275_v19, %v1274_v10  ;;  %v1408_v24 = vmul.f32 %v1275_v19, %v1275_v19 }
 0x107   : > { %v1819_v27 = vpop.f32.mrb[4].mxu0  ;;  %v1851_v36 = vpop.f32.mrb[4].mxu1 }
 0x108   : > { %v1339_v32 = vadd.f32 %v1338_v23, %v1276_v18  ;;  %v1471_v33 = vadd.f32 %v1408_v24, %v1407_v22  ;;  %v657_v34 = vadd.f32 %v1819_v27, %v2264_v52  ;;  %v648_v35 = vpop.f32.mrb[5].mxu0  ;;  %v2348_v42 = vadd.f32 %v1851_v36, %v2264_v52  ;;  %v776_v44 = vpop.f32.mrb[5].mxu1 }
 0x109   : > { %v649_v37 = vadd.f32 %v2264_v52, %v648_v35  ;;  %v1820_v38 = vpop.f32.mrb[6].mxu0  ;;  %v1852_v50 = vpop.f32.mrb[6].mxu1  ;;  %v2376_v3 = vadd.f32 %v2264_v52, %v776_v44  ;;  %v2394_v24 = vadd.s32 %v2246_v43, %v971_v56  ;;  %v2418_v44 = vadd.s32 %v2246_v43, %v970_v55 }
 0x10a   : > { %v1472_v46 = vadd.f32 %v1471_v33, %v1409_v31  ;;  %893 = vst [vmem:[%s2288_s8 + $0x30] sm:$0xff] %v657_v34  ;;  %v1340_v47 = vadd.f32 %v1339_v32, %v1277_v26  ;;  %v660_v48 = vadd.f32 %v1820_v38, %v2264_v52  ;;  %v651_v49 = vpop.f32.mrb[7].mxu0  ;;  %925 = vst [vmem:[%s2288_s8 + $0x130] sm:$0xff] %v2348_v42  ;;  %v779_v60 = vpop.f32.mrb[7].mxu1  ;;  %v1280_v0 = vsel %vm1088_vm6, %v657_v34, 0.0 }
 0x10b   : > { %891 = vst [vmem:[%s2288_s8 + $0x20] sm:$0xff] %v649_v37  ;;  %v1278_v51 = vsel %vm1086_vm7, %v649_v37, 0.0  ;;  %v652_v53 = vadd.f32 %v2264_v52, %v651_v49  ;;  %923 = vst [vmem:[%s2288_s8 + $0x120] sm:$0xff] %v2376_v3  ;;  %v2385_v59 = vadd.f32 %v1852_v50, %v2264_v52  ;;  %v2388_v12 = vadd.f32 %v2264_v52, %v779_v60 }
 0x10c   : > { %v1341_v61 = vadd.f32 %v1340_v47, %v1278_v51  ;;  %v1411_v62 = vmul.f32 %v1278_v51, %v1278_v51  ;;  %v1473_v63 = vadd.f32 %v1472_v46, %v1410_v45  ;;  %894 = vst [vmem:[%s2288_s8 + $0x38] sm:$0xff] %v660_v48  ;;  %v1281_v10 = vsel %vm1089_vm9, %v660_v48, 0.0 }
 0x10d   : > { %892 = vst [vmem:[%s2288_s8 + $0x28] sm:$0xff] %v652_v53  ;;  %v1279_v1 = vsel %vm1087_vm8, %v652_v53, 0.0  ;;  %v1413_v13 = vmul.f32 %v1280_v0, %v1280_v0  ;;  %v2397_v26 = vadd.s32 %v2246_v43, %v969_v2  ;;  %926 = vst [vmem:[%s2288_s8 + $0x138] sm:$0xff] %v2385_v59  ;;  %v1414_v30 = vmul.f32 %v1281_v10, %v1281_v10 }
 0x10e   : > { %v1474_v5 = vadd.f32 %v1473_v63, %v1411_v62  ;;  %v1342_v6 = vadd.f32 %v1341_v61, %v1279_v1  ;;  %v1412_v7 = vmul.f32 %v1279_v1, %v1279_v1  ;;  %924 = vst [vmem:[%s2288_s8 + $0x128] sm:$0xff] %v2388_v12  ;;  %v2415_v38 = vadd.s32 %v2246_v43, %v972_v9 }
 0x10f   : > { %v1823_v11 = vpop.f32.mrb[8].mxu0  ;;  %v1855_v20 = vpop.f32.mrb[8].mxu1  ;;  %v973_v51 = vadd.s32 160, %v2242_v41  ;;  %v976_v53 = vadd.s32 184, %v2242_v41  ;;  %v974_v63 = vadd.s32 168, %v2242_v41  ;;  %vm1098_vm2 = vcmp.lt.s32.totalorder %v2397_v26, 1024 }
 0x110   : > { %v1343_v17 = vadd.f32 %v1342_v6, %v1280_v0  ;;  %v1475_v18 = vadd.f32 %v1474_v5, %v1412_v7  ;;  %v673_v58 = vadd.f32 %v1823_v11, %v2264_v52  ;;  %v664_v19 = vpop.f32.mrb[9].mxu0  ;;  %v2404_v27 = vadd.f32 %v1855_v20, %v2264_v52  ;;  %v792_v29 = vpop.f32.mrb[9].mxu1 }
 0x111   : > { %v665_v22 = vadd.f32 %v2264_v52, %v664_v19  ;;  %v1824_v23 = vpop.f32.mrb[10].mxu0  ;;  %v1856_v35 = vpop.f32.mrb[10].mxu1  ;;  %v2436_v14 = vadd.f32 %v2264_v52, %v792_v29  ;;  %v2448_v55 = vadd.s32 %v2246_v43, %v975_v15  ;;  %vm1100_vm3 = vcmp.lt.s32.totalorder %v2394_v24, 1024 }
 0x112   : > { %v1476_v31 = vadd.f32 %v1475_v18, %v1413_v13  ;;  %897 = vst [vmem:[%s2288_s8 + $0x50] sm:$0xff] %v673_v58  ;;  %v1344_v32 = vadd.f32 %v1343_v17, %v1281_v10  ;;  %v676_v33 = vadd.f32 %v1824_v23, %v2264_v52  ;;  %v667_v34 = vpop.f32.mrb[11].mxu0  ;;  %929 = vst [vmem:[%s2288_s8 + $0x150] sm:$0xff] %v2404_v27  ;;  %v795_v45 = vpop.f32.mrb[11].mxu1  ;;  %v1284_v49 = vsel %vm1092_vm11, %v673_v58, 0.0 }
 0x113   : > { %895 = vst [vmem:[%s2288_s8 + $0x40] sm:$0xff] %v665_v22  ;;  %v1282_v36 = vsel %vm1090_vm10, %v665_v22, 0.0  ;;  %v668_v37 = vadd.f32 %v2264_v52, %v667_v34  ;;  %v2439_v16 = vadd.f32 %v1856_v35, %v2264_v52  ;;  %v2442_v1 = vadd.f32 %v2264_v52, %v795_v45  ;;  %927 = vst [vmem:[%s2288_s8 + $0x140] sm:$0xff] %v2436_v14 }
 0x114   : > { %v1345_v46 = vadd.f32 %v1344_v32, %v1282_v36  ;;  %v1415_v47 = vmul.f32 %v1282_v36, %v1282_v36  ;;  %v1477_v48 = vadd.f32 %v1476_v31, %v1414_v30  ;;  %898 = vst [vmem:[%s2288_s8 + $0x58] sm:$0xff] %v676_v33  ;;  %v1285_v56 = vsel %vm1093_vm13, %v676_v33, 0.0 }
 0x115   : > { %896 = vst [vmem:[%s2288_s8 + $0x48] sm:$0xff] %v668_v37  ;;  %v1283_v50 = vsel %vm1091_vm12, %v668_v37, 0.0  ;;  %v1417_v2 = vmul.f32 %v1284_v49, %v1284_v49  ;;  %v2451_v13 = vadd.s32 %v2246_v43, %v973_v51  ;;  %930 = vst [vmem:[%s2288_s8 + $0x158] sm:$0xff] %v2439_v16  ;;  %v1418_v18 = vmul.f32 %v1285_v56, %v1285_v56 }
 0x116   : > { %v1478_v60 = vadd.f32 %v1477_v48, %v1415_v47  ;;  %v1346_v61 = vadd.f32 %v1345_v46, %v1283_v50  ;;  %v1416_v62 = vmul.f32 %v1283_v50, %v1283_v50  ;;  %928 = vst [vmem:[%s2288_s8 + $0x148] sm:$0xff] %v2442_v1  ;;  %vm1099_vm4 = vcmp.lt.s32.totalorder %v2418_v44, 1024 }
 0x117   : > { %v1827_v0 = vpop.f32.mrb[12].mxu0  ;;  %v1859_v9 = vpop.f32.mrb[12].mxu1  ;;  %vm1101_vm5 = vcmp.lt.s32.totalorder %v2415_v38, 1024  ;;  %v2469_v31 = vadd.s32 %v2246_v43, %v976_v53  ;;  %v2472_v32 = vadd.s32 %v2246_v43, %v974_v63  ;;  %v979_v37 = vadd.s32 208, %v2242_v41 }
 0x118   : > { %v1347_v5 = vadd.f32 %v1346_v61, %v1284_v49  ;;  %v1479_v6 = vadd.f32 %v1478_v60, %v1416_v62  ;;  %v689_v28 = vadd.f32 %v1827_v0, %v2264_v52  ;;  %v680_v7 = vpop.f32.mrb[13].mxu0  ;;  %v808_v17 = vpop.f32.mrb[13].mxu1  ;;  %v977_v46 = vadd.s32 192, %v2242_v41 }
 0x119   : > { %v681_v10 = vadd.f32 %v2264_v52, %v680_v7  ;;  %v1828_v11 = vpop.f32.mrb[14].mxu0  ;;  %v1860_v23 = vpop.f32.mrb[14].mxu1  ;;  %v980_v47 = vadd.s32 216, %v2242_v41  ;;  %v2484_v50 = vadd.f32 %v1859_v9, %v2264_v52  ;;  %v2489_v53 = vadd.f32 %v2264_v52, %v808_v17 }
 0x11a   : > { %v1480_v58 = vadd.f32 %v1479_v6, %v1417_v2  ;;  %901 = vst [vmem:[%s2288_s8 + $0x70] sm:$0xff] %v689_v28  ;;  %v1348_v19 = vadd.f32 %v1347_v5, %v1285_v56  ;;  %v692_v20 = vadd.f32 %v1828_v11, %v2264_v52  ;;  %v683_v22 = vpop.f32.mrb[15].mxu0  ;;  %v811_v33 = vpop.f32.mrb[15].mxu1  ;;  %v1288_v40 = vsel %vm1096_vm15, %v689_v28, 0.0 }
 0x11b   : > { %899 = vst [vmem:[%s2288_s8 + $0x60] sm:$0xff] %v681_v10  ;;  %v1286_v29 = vsel %vm1094_vm14, %v681_v10, 0.0  ;;  %v684_v30 = vadd.f32 %v2264_v52, %v683_v22  ;;  %v2492_v57 = vadd.f32 %v1860_v23, %v2264_v52  ;;  %v2495_v60 = vadd.f32 %v2264_v52, %v811_v33  ;;  %933 = vst [vmem:[%s2288_s8 + $0x170] sm:$0xff] %v2484_v50 }
 0x11c   : > { %v1349_v34 = vadd.f32 %v1348_v19, %v1286_v29  ;;  %v1419_v35 = vmul.f32 %v1286_v29, %v1286_v29  ;;  %v1481_v36 = vadd.f32 %v1480_v58, %v1418_v18  ;;  %902 = vst [vmem:[%s2288_s8 + $0x78] sm:$0xff] %v692_v20  ;;  %v1289_v51 = vsel %vm1097_vm1, %v692_v20, 0.0  ;;  %931 = vst [vmem:[%s2288_s8 + $0x160] sm:$0xff] %v2489_v53 }
 0x11d   : > { %900 = vst [vmem:[%s2288_s8 + $0x68] sm:$0xff] %v684_v30  ;;  %v1287_v45 = vsel %vm1095_vm0, %v684_v30, 0.0  ;;  %v1421_v61 = vmul.f32 %v1288_v40, %v1288_v40  ;;  %vm1104_vm6 = vcmp.lt.s32.totalorder %v2448_v55, 1024  ;;  %vm1102_vm7 = vcmp.lt.s32.totalorder %v2451_v13, 1024  ;;  %934 = vst [vmem:[%s2288_s8 + $0x178] sm:$0xff] %v2492_v57 }
 0x11e   : > { %v1482_v48 = vadd.f32 %v1481_v36, %v1419_v35  ;;  %v1350_v15 = vadd.f32 %v1349_v34, %v1287_v45  ;;  %v1420_v49 = vmul.f32 %v1287_v45, %v1287_v45  ;;  %v978_v6 = vadd.s32 200, %v2242_v41  ;;  %932 = vst [vmem:[%s2288_s8 + $0x168] sm:$0xff] %v2495_v60 }
 0x11f   : > { %v1831_v39 = vpop.f32.mrb[16].mxu0  ;;  %v1863_v0 = vpop.f32.mrb[16].mxu1  ;;  %v1422_v7 = vmul.f32 %v1289_v51, %v1289_v51  ;;  %vm1103_vm8 = vcmp.lt.s32.totalorder %v2472_v32, 1024  ;;  %v2518_v20 = vadd.s32 %v2246_v43, %v979_v37  ;;  %v2521_v22 = vadd.s32 %v2246_v43, %v977_v46 }
 0x120   : > { %v1351_v62 = vadd.f32 %v1350_v15, %v1288_v40  ;;  %v1483_v63 = vadd.f32 %v1482_v48, %v1420_v49  ;;  %v705_v54 = vadd.f32 %v1831_v39, %v2264_v52  ;;  %v696_v56 = vpop.f32.mrb[17].mxu0  ;;  %v824_v28 = vpop.f32.mrb[17].mxu1  ;;  %vm1105_vm9 = vcmp.lt.s32.totalorder %v2469_v31, 1024 }
 0x121   : > { %v697_v2 = vadd.f32 %v2264_v52, %v696_v56  ;;  %v1832_v5 = vpop.f32.mrb[18].mxu0  ;;  %v1864_v18 = vpop.f32.mrb[18].mxu1  ;;  %v2526_v34 = vadd.s32 %v2246_v43, %v980_v47  ;;  %v2534_v36 = vadd.s32 %v2246_v43, %v978_v6  ;;  %v983_v37 = vadd.s32 240, %v2242_v41 }
 0x122   : > { %v1484_v9 = vadd.f32 %v1483_v63, %v1421_v61  ;;  %905 = vst [vmem:[%s2288_s8 + $0x90] sm:$0xff] %v705_v54  ;;  %v1352_v10 = vadd.f32 %v1351_v62, %v1289_v51  ;;  %v708_v11 = vadd.f32 %v1832_v5, %v2264_v52  ;;  %v699_v17 = vpop.f32.mrb[19].mxu0  ;;  %v827_v23 = vpop.f32.mrb[19].mxu1  ;;  %v1292_v26 = vsel %vm1100_vm3, %v705_v54, 0.0 }
 0x123   : > { %903 = vst [vmem:[%s2288_s8 + $0x80] sm:$0xff] %v697_v2  ;;  %v1290_v58 = vsel %vm1098_vm2, %v697_v2, 0.0  ;;  %v700_v19 = vadd.f32 %v2264_v52, %v699_v17  ;;  %v2540_v15 = vadd.f32 %v1863_v0, %v2264_v52  ;;  %v2543_v24 = vadd.f32 %v2264_v52, %v824_v28 }
 0x124   : > { %v1353_v29 = vadd.f32 %v1352_v10, %v1290_v58  ;;  %v1423_v30 = vmul.f32 %v1290_v58, %v1290_v58  ;;  %v1485_v33 = vadd.f32 %v1484_v9, %v1422_v7  ;;  %906 = vst [vmem:[%s2288_s8 + $0x98] sm:$0xff] %v708_v11  ;;  %v1293_v45 = vsel %vm1101_vm5, %v708_v11, 0.0 }
 0x125   : > { %904 = vst [vmem:[%s2288_s8 + $0x88] sm:$0xff] %v700_v19  ;;  %v1291_v35 = vsel %vm1099_vm4, %v700_v19, 0.0  ;;  %v2546_v44 = vadd.f32 %v1864_v18, %v2264_v52  ;;  %v2549_v49 = vadd.f32 %v2264_v52, %v827_v23  ;;  %v1425_v38 = vmul.f32 %v1292_v26, %v1292_v26  ;;  %937 = vst [vmem:[%s2288_s8 + $0x190] sm:$0xff] %v2540_v15 }
 0x126   : > { %v1486_v40 = vadd.f32 %v1485_v33, %v1423_v30  ;;  %v1354_v46 = vadd.f32 %v1353_v29, %v1291_v35  ;;  %v1424_v48 = vmul.f32 %v1291_v35, %v1291_v35  ;;  %vm1108_vm10 = vcmp.lt.s32.totalorder %v2518_v20, 1024  ;;  %935 = vst [vmem:[%s2288_s8 + $0x180] sm:$0xff] %v2543_v24 }
 0x127   : > { %v1835_v47 = vpop.f32.mrb[20].mxu0  ;;  %v1867_v63 = vpop.f32.mrb[20].mxu1  ;;  %vm1106_vm11 = vcmp.lt.s32.totalorder %v2521_v22, 1024  ;;  %v981_v0 = vadd.s32 224, %v2242_v41  ;;  %v984_v2 = vadd.s32 248, %v2242_v41  ;;  %938 = vst [vmem:[%s2288_s8 + $0x198] sm:$0xff] %v2546_v44  ;;  %v1426_v6 = vmul.f32 %v1293_v45, %v1293_v45 }
 0x128   : > { %v1355_v51 = vadd.f32 %v1354_v46, %v1292_v26  ;;  %v1487_v39 = vadd.f32 %v1486_v40, %v1424_v48  ;;  %v721_v61 = vadd.f32 %v1835_v47, %v2264_v52  ;;  %v712_v62 = vpop.f32.mrb[21].mxu0  ;;  %936 = vst [vmem:[%s2288_s8 + $0x188] sm:$0xff] %v2549_v49  ;;  %v840_v5 = vpop.f32.mrb[21].mxu1  ;;  %vm1107_vm12 = vcmp.lt.s32.totalorder %v2534_v36, 1024 }
 0x129   : > { %v713_v54 = vadd.f32 %v2264_v52, %v712_v62  ;;  %v1836_v56 = vpop.f32.mrb[22].mxu0  ;;  %v1868_v11 = vpop.f32.mrb[22].mxu1  ;;  %vm1109_vm13 = vcmp.lt.s32.totalorder %v2526_v34, 1024  ;;  %v2577_v33 = vadd.s32 %v2246_v43, %v983_v37  ;;  %v2583_v13 = vadd.s32 %v2246_v43, %v981_v0 }
 0x12a   : > { %v1488_v28 = vadd.f32 %v1487_v39, %v1425_v38  ;;  %909 = vst [vmem:[%s2288_s8 + $0xb0] sm:$0xff] %v721_v61  ;;  %v1356_v7 = vadd.f32 %v1355_v51, %v1293_v45  ;;  %v724_v9 = vadd.f32 %v1836_v56, %v2264_v52  ;;  %v715_v10 = vpop.f32.mrb[23].mxu0  ;;  %v1296_v17 = vsel %vm1104_vm6, %v721_v61, 0.0  ;;  %v843_v19 = vpop.f32.mrb[23].mxu1 }
 0x12b   : > { %907 = vst [vmem:[%s2288_s8 + $0xa0] sm:$0xff] %v713_v54  ;;  %v1294_v18 = vsel %vm1102_vm7, %v713_v54, 0.0  ;;  %v716_v58 = vadd.f32 %v2264_v52, %v715_v10  ;;  %v2586_v26 = vadd.s32 %v2246_v43, %v984_v2  ;;  %v982_v35 = vadd.s32 232, %v2242_v41 }
 0x12c   : > { %v1357_v23 = vadd.f32 %v1356_v7, %v1294_v18  ;;  %v1427_v29 = vmul.f32 %v1294_v18, %v1294_v18  ;;  %v1489_v30 = vadd.f32 %v1488_v28, %v1426_v6  ;;  %910 = vst [vmem:[%s2288_s8 + $0xb8] sm:$0xff] %v724_v9  ;;  %v1429_v40 = vmul.f32 %v1296_v17, %v1296_v17 }
 0x12d   : > { %908 = vst [vmem:[%s2288_s8 + $0xa8] sm:$0xff] %v716_v58  ;;  %v1295_v55 = vsel %vm1103_vm8, %v716_v58, 0.0  ;;  %v1297_v37 = vsel %vm1105_vm9, %v724_v9, 0.0  ;;  %v2592_v32 = vadd.f32 %v1867_v63, %v2264_v52  ;;  %v2595_v38 = vadd.f32 %v2264_v52, %v840_v5 }
 0x12e   : > { %v1490_v45 = vadd.f32 %v1489_v30, %v1427_v29  ;;  %v1358_v46 = vadd.f32 %v1357_v23, %v1295_v55  ;;  %v1428_v48 = vmul.f32 %v1295_v55, %v1295_v55  ;;  %v2598_v51 = vadd.f32 %v1868_v11, %v2264_v52 }
 0x12f   : > { %v1839_v47 = vpop.f32.mrb[24].mxu0  ;;  %v2602_v54 = vadd.f32 %v2264_v52, %v843_v19  ;;  %v1871_v56 = vpop.f32.mrb[24].mxu1  ;;  %vm1110_vm14 = vcmp.lt.s32.totalorder %v2583_v13, 1024  ;;  %v985_v2 = vadd.s32 256, %v2242_v41  ;;  %v986_v5 = vadd.s32 264, %v2242_v41  ;;  %941 = vst [vmem:[%s2288_s8 + $0x1b0] sm:$0xff] %v2592_v32 }
 0x130   : > { %v1359_v39 = vadd.f32 %v1358_v46, %v1296_v17  ;;  %v1491_v61 = vadd.f32 %v1490_v45, %v1428_v48  ;;  %v737_v62 = vadd.f32 %v1839_v47, %v2264_v52  ;;  %v728_v31 = vpop.f32.mrb[25].mxu0  ;;  %939 = vst [vmem:[%s2288_s8 + $0x1a0] sm:$0xff] %v2595_v38  ;;  %942 = vst [vmem:[%s2288_s8 + $0x1b8] sm:$0xff] %v2598_v51  ;;  %v856_v6 = vpop.f32.mrb[25].mxu1  ;;  %vm1112_vm15 = vcmp.lt.s32.totalorder %v2577_v33, 1024 }
 0x131   : > { %v729_v63 = vadd.f32 %v2264_v52, %v728_v31  ;;  %v1840_v0 = vpop.f32.mrb[26].mxu0  ;;  %v1430_v28 = vmul.f32 %v1297_v37, %v1297_v37  ;;  %940 = vst [vmem:[%s2288_s8 + $0x1a8] sm:$0xff] %v2602_v54  ;;  %v1872_v17 = vpop.f32.mrb[26].mxu1  ;;  %v1047_v23 = vadd.s32 %v2246_v43, %v982_v35  ;;  %vm1113_vm0 = vcmp.lt.s32.totalorder %v2586_v26, 1024 }
 0x132   : > { %v1492_v7 = vadd.f32 %v1491_v61, %v1429_v40  ;;  %913 = vst [vmem:[%s2288_s8 + $0xd0] sm:$0xff] %v737_v62  ;;  %v1360_v9 = vadd.f32 %v1359_v39, %v1297_v37  ;;  %v740_v10 = vadd.f32 %v1840_v0, %v2264_v52  ;;  %v731_v11 = vpop.f32.mrb[27].mxu0  ;;  %v1300_v18 = vsel %vm1108_vm10, %v737_v62, 0.0  ;;  %v859_v29 = vpop.f32.mrb[27].mxu1 }
 0x133   : > { %911 = vst [vmem:[%s2288_s8 + $0xc0] sm:$0xff] %v729_v63  ;;  %v1298_v58 = vsel %vm1106_vm11, %v729_v63, 0.0  ;;  %v732_v19 = vadd.f32 %v2264_v52, %v731_v11  ;;  %v987_v45 = vadd.s32 272, %v2242_v41  ;;  %v1050_v22 = vadd.s32 %v2246_v43, %v985_v2 }
 0x134   : > { %v1361_v30 = vadd.f32 %v1360_v9, %v1298_v58  ;;  %v1431_v55 = vmul.f32 %v1298_v58, %v1298_v58  ;;  %v1493_v40 = vadd.f32 %v1492_v7, %v1430_v28  ;;  %914 = vst [vmem:[%s2288_s8 + $0xd8] sm:$0xff] %v740_v10  ;;  %v988_v46 = vadd.s32 280, %v2242_v41 }
 0x135   : > { %912 = vst [vmem:[%s2288_s8 + $0xc8] sm:$0xff] %v732_v19  ;;  %v1299_v20 = vsel %vm1107_vm12, %v732_v19, 0.0  ;;  %v2635_v48 = vadd.s32 %v2246_v43, %v986_v5  ;;  %v1433_v35 = vmul.f32 %v1300_v18, %v1300_v18  ;;  %v1301_v61 = vsel %vm1109_vm13, %v740_v10, 0.0 }
 0x136   : > { %v1494_v37 = vadd.f32 %v1493_v40, %v1431_v55  ;;  %v1362_v47 = vadd.f32 %v1361_v30, %v1299_v20  ;;  %v1432_v39 = vmul.f32 %v1299_v20, %v1299_v20  ;;  %v2640_v36 = vadd.f32 %v1871_v56, %v2264_v52 }
 0x137   : > { %v1843_v62 = vpop.f32.mrb[28].mxu0  ;;  %v2643_v31 = vadd.f32 %v2264_v52, %v856_v6  ;;  %v2646_v63 = vadd.f32 %v1872_v17, %v2264_v52  ;;  %v2650_v28 = vadd.f32 %v2264_v52, %v859_v29  ;;  %v1875_v7 = vpop.f32.mrb[28].mxu1  ;;  %vm1111_vm1 = vcmp.lt.s32.totalorder %v1047_v23, 1024 }
 0x138   : > { %v1363_v0 = vadd.f32 %v1362_v47, %v1300_v18  ;;  %v1495_v2 = vadd.f32 %v1494_v37, %v1432_v39  ;;  %v753_v5 = vadd.f32 %v1843_v62, %v2264_v52  ;;  %v744_v34 = vpop.f32.mrb[29].mxu0  ;;  %v2654_v6 = vadd.s32 %v2246_v43, %v987_v45  ;;  %945 = vst [vmem:[%s2288_s8 + $0x1d0] sm:$0xff] %v2640_v36  ;;  %v872_v11 = vpop.f32.mrb[29].mxu1 }
 0x139   : > { %v745_v56 = vadd.f32 %v2264_v52, %v744_v34  ;;  %v1844_v9 = vpop.f32.mrb[30].mxu0  ;;  %v989_v10 = vadd.s32 288, %v2242_v41  ;;  %943 = vst [vmem:[%s2288_s8 + $0x1c0] sm:$0xff] %v2643_v31  ;;  %946 = vst [vmem:[%s2288_s8 + $0x1d8] sm:$0xff] %v2646_v63  ;;  %v1434_v17 = vmul.f32 %v1301_v61, %v1301_v61  ;;  %v1876_v30 = vpop.f32.mrb[30].mxu1  ;;  %vm1114_vm2 = vcmp.lt.s32.totalorder %v1050_v22, 1024 }
 0x13a   : > { %v1496_v18 = vadd.f32 %v1495_v2, %v1433_v35  ;;  %917 = vst [vmem:[%s2288_s8 + $0xf0] sm:$0xff] %v753_v5  ;;  %v1364_v58 = vadd.f32 %v1363_v0, %v1301_v61  ;;  %v756_v19 = vadd.f32 %v1844_v9, %v2264_v52  ;;  %v747_v29 = vpop.f32.mrb[31].mxu0  ;;  %944 = vst [vmem:[%s2288_s8 + $0x1c8] sm:$0xff] %v2650_v28  ;;  %v875_v20 = vpop.f32.mrb[31].mxu1  ;;  %vm1115_vm3 = vcmp.lt.s32.totalorder %v2635_v48, 1024 }
 0x13b   : > { %915 = vst [vmem:[%s2288_s8 + $0xe0] sm:$0xff] %v745_v56  ;;  %v1302_v55 = vsel %vm1110_vm14, %v745_v56, 0.0  ;;  %v748_v40 = vadd.f32 %v2264_v52, %v747_v29  ;;  %v2672_v45 = vadd.s32 %v2246_v43, %v988_v46  ;;  %v1304_v39 = vsel %vm1112_vm15, %v753_v5, 0.0 }
 0x13c   : > { %v1365_v35 = vadd.f32 %v1364_v58, %v1302_v55  ;;  %v1435_v37 = vmul.f32 %v1302_v55, %v1302_v55  ;;  %v1497_v47 = vadd.f32 %v1496_v18, %v1434_v17  ;;  %918 = vst [vmem:[%s2288_s8 + $0xf8] sm:$0xff] %v756_v19  ;;  %v2683_v61 = vadd.s32 %v2246_v43, %v989_v10 }
 0x13d   : > { %916 = vst [vmem:[%s2288_s8 + $0xe8] sm:$0xff] %v748_v40  ;;  %v1303_v13 = vsel %vm1111_vm1, %v748_v40, 0.0  ;;  %v990_v46 = vadd.s32 296, %v2242_v41  ;;  %v1306_v34 = vsel %vm1114_vm2, %v2295_v8, 0.0  ;;  %v1305_v33 = vsel %vm1113_vm0, %v756_v19, 0.0 }
 0x13e   : > { %v1498_v62 = vadd.f32 %v1497_v47, %v1435_v37  ;;  %v1366_v0 = vadd.f32 %v1365_v35, %v1303_v13  ;;  %v1436_v2 = vmul.f32 %v1303_v13, %v1303_v13  ;;  %v2691_v23 = vadd.f32 %v1875_v7, %v2264_v52 }
 0x13f   : > { %v2694_v5 = vadd.f32 %v2264_v52, %v872_v11  ;;  %v2697_v56 = vadd.f32 %v1876_v30, %v2264_v52  ;;  %v1437_v8 = vmul.f32 %v1304_v39, %v1304_v39  ;;  %v2707_v7 = vadd.f32 %v2264_v52, %v875_v20 }
 0x140   : > { %v1367_v26 = vadd.f32 %v1366_v0, %v1304_v39  ;;  %v1499_v22 = vadd.f32 %v1498_v62, %v1436_v2  ;;  %vm1116_vm4 = vcmp.lt.s32.totalorder %v2654_v6, 1024  ;;  %v991_v9 = vadd.s32 304, %v2242_v41  ;;  %949 = vst [vmem:[%s2288_s8 + $0x1f0] sm:$0xff] %v2691_v23 }
 0x141   : > { %v992_v10 = vadd.s32 312, %v2242_v41  ;;  %947 = vst [vmem:[%s2288_s8 + $0x1e0] sm:$0xff] %v2694_v5  ;;  %950 = vst [vmem:[%s2288_s8 + $0x1f8] sm:$0xff] %v2697_v56  ;;  %v1438_v11 = vmul.f32 %v1305_v33, %v1305_v33  ;;  %v1439_v18 = vmul.f32 %v1306_v34, %v1306_v34  ;;  %vm1117_vm5 = vcmp.lt.s32.totalorder %v2672_v45, 1024 }
 0x142   : > { %v1500_v17 = vadd.f32 %v1499_v22, %v1437_v8  ;;  %v1368_v52 = vadd.f32 %v1367_v26, %v1305_v33  ;;  %948 = vst [vmem:[%s2288_s8 + $0x1e8] sm:$0xff] %v2707_v7  ;;  %v1307_v58 = vsel %vm1115_vm3, %v2326_v25, 0.0  ;;  %v1055_v19 = vadd.s32 %v2246_v43, %v990_v46 }
 0x143   : > { %1991 = shalt.err (!%p1988_p3)
}
 0x144   : > { %s1992_s28 = scalar_lea.hbm %s2702_s13, 8192  ;;  %s1996_s6 = scalar_lea.hbm %s2885_s3, 16384 }
 0x145   : > { %p1993_p4 = scmp.ne.s32.totalorder %s2702_s13, %s1992_s28  ;;  %p1997_p9 = scmp.lt.u32.totalorder %s2702_s13, %s2885_s3 }
 0x146   : > { %p1998_p10 = scmp.lt.u32.totalorder %s1996_s6, %s1992_s28  ;;  %p2000_p12 = scmp.lt.u32.totalorder %s1992_s28, %s2702_s13 }
 0x147   : > { %p1994_p7 = pnand %p1993_p4, %p2141_p5 }
 0x148   : > { %p1999_p11 = por %p1998_p10, %p1997_p9 }
 0x149   : > { %p1995_p8 = pneg %p1994_p7 }
 0x14a   : > { %p2001_p13 = por %p2000_p12, %p1999_p11 }
 0x14c   : > { %p2002_p0 = pnand %p2001_p13, %p1995_p8 }
 0x14e   : > { %2005 = shalt.err (!%p2002_p0)
}
 0x14f   : > { %s2075_s9 = smov 128   ;;  %s2076_s11 = smov 8   ;;  %v1369_v25 = vadd.f32 %v1368_v52, %v1306_v34  ;;  %v1501_v48 = vadd.f32 %v1500_v17, %v1438_v11  ;;  %vm1118_vm6 = vcmp.lt.s32.totalorder %v2683_v61, 1024  ;;  %v993_v29 = vadd.s32 320, %v2242_v41 }
 0x150   : > { %1893 = dma.vmem_to_hbm [thread:$0]  (%p2141_p5), %s2704_s10, 8192, %s2702_s13, %s1546_s14, %s2075_s9, %s2075_s9, %s2076_s11   ;;  %v1308_v30 = vsel %vm1116_vm4, %v2286_v4, 0.0  ;;  %v1056_v55 = vadd.s32 %v2246_v43, %v991_v9  ;;  %v1440_v35 = vmul.f32 %v1307_v58, %v1307_v58  ;;  %v1057_v37 = vadd.s32 %v2246_v43, %v992_v10 }
 0x151   : > { %v1502_v40 = vadd.f32 %v1501_v48, %v1439_v18  ;;  %v1370_v20 = vadd.f32 %v1369_v25, %v1307_v58  ;;  %v1309_v47 = vsel %vm1117_vm5, %v2323_v21, 0.0  ;;  %v1310_v39 = vsel %vm1118_vm6, %v2376_v3, 0.0  ;;  %s1676_s10 = sshll.u32 %s2249_s30, 3  ;;  %s1756_s12 = sshll.u32 %s2124_s19, 7 }
 0x152   : > { %vm1119_vm7 = vcmp.lt.s32.totalorder %v1055_v19, 1024  ;;  %v994_v13 = vadd.s32 328, %v2242_v41  ;;  %v1441_v61 = vmul.f32 %v1308_v30, %v1308_v30  ;;  %v1058_v4 = vadd.s32 %v2246_v43, %v993_v29  ;;  %s202_s13 = scalar_lea.vmem [#allocation4], %s1676_s10  ;;  %s2839_s23 = scalar_lea.hbm %s2886_s4, %s1756_s12 }
 0x153   : > { %v1371_v46 = vadd.f32 %v1370_v20, %v1308_v30  ;;  %v1503_v6 = vadd.f32 %v1502_v40, %v1440_v35  ;;  %vm1120_vm8 = vcmp.lt.s32.totalorder %v1056_v55, 1024  ;;  %v995_v62 = vadd.s32 336, %v2242_v41  ;;  %s1580_s14 = sshll.u32 %s202_s13, 4  ;;  %s1551_s27 = scalar_lea.sflag [#allocation5], %s2249_s30  ;;  %s2841_s14 = int_to_ptr.vmem [resolvable:$true] %s1580_s14 }
 0x154   : > { %v996_v0 = vadd.s32 344, %v2242_v41  ;;  %v1442_v2 = vmul.f32 %v1309_v47, %v1309_v47  ;;  %v1443_v45 = vmul.f32 %v1310_v39, %v1310_v39  ;;  %vm1121_vm9 = vcmp.lt.s32.totalorder %v1057_v37, 1024  ;;  %s2006_s19 = scalar_lea.vmem %s2841_s14, 128  ;;  %s2077_s28 = smov [#allocation4]  }
 0x155   : > { %v1504_v34 = vadd.f32 %v1503_v6, %v1441_v61  ;;  %v1372_v33 = vadd.f32 %v1371_v46, %v1309_v47  ;;  %v1311_v21 = vsel %vm1119_vm7, %v2388_v12, 0.0  ;;  %v1059_v3 = vadd.s32 %v2246_v43, %v994_v13  ;;  %p2007_p1 = scmp.ne.s32.totalorder %s2841_s14, %s2006_s19  ;;  %s2010_s29 = sshll.u32 %s2077_s28, 4  ;;  %s2011_s29 = int_to_ptr.vmem [resolvable:$false] %s2010_s29 }
 0x156   : > { %vm1122_vm10 = vcmp.lt.s32.totalorder %v1058_v4, 1024  ;;  %v997_v22 = vadd.s32 352, %v2242_v41  ;;  %v1312_v9 = vsel %vm1120_vm8, %v2348_v42, 0.0  ;;  %v1060_v10 = vadd.s32 %v2246_v43, %v995_v62  ;;  %s2012_s5 = scalar_lea.vmem %s2011_s29, 256  ;;  %p2013_p4 = scmp.lt.s32.totalorder %s2841_s14, %s2011_s29 }
 0x157   : > { %v1373_v8 = vadd.f32 %v1372_v33, %v1310_v39  ;;  %v1505_v26 = vadd.f32 %v1504_v34, %v1442_v2  ;;  %v1444_v52 = vmul.f32 %v1311_v21, %v1311_v21  ;;  %v1061_v18 = vadd.s32 %v2246_v43, %v996_v0  ;;  %p2008_p2 = pnand %p2007_p1, %p2141_p5  ;;  %p2014_p7 = scmp.lt.s32.totalorder %s2012_s5, %s2006_s19 }
 0x158   : > { %v1313_v58 = vsel %vm1121_vm9, %v2385_v59, 0.0  ;;  %v1314_v12 = vsel %vm1122_vm10, %v2436_v14, 0.0  ;;  %vm1123_vm11 = vcmp.lt.s32.totalorder %v1059_v3, 1024  ;;  %v998_v19 = vadd.s32 360, %v2242_v41 }
 0x159   : > { %v1506_v11 = vadd.f32 %v1505_v26, %v1443_v45  ;;  %v1374_v17 = vadd.f32 %v1373_v8, %v1311_v21  ;;  %v1445_v25 = vmul.f32 %v1312_v9, %v1312_v9  ;;  %v1062_v30 = vadd.s32 %v2246_v43, %v997_v22  ;;  %p2009_p3 = pneg %p2008_p2  ;;  %p2015_p8 = por %p2014_p7, %p2013_p4 }
 0x15a   : > { %vm1124_vm12 = vcmp.lt.s32.totalorder %v1060_v10, 1024  ;;  %v999_v42 = vadd.s32 368, %v2242_v41  ;;  %v1000_v55 = vadd.s32 376, %v2242_v41  ;;  %v1446_v40 = vmul.f32 %v1313_v58, %v1313_v58 }
 0x15b   : > { %v1375_v48 = vadd.f32 %v1374_v17, %v1312_v9  ;;  %v1507_v29 = vadd.f32 %v1506_v11, %v1444_v52  ;;  %v1447_v37 = vmul.f32 %v1314_v12, %v1314_v12  ;;  %vm1125_vm13 = vcmp.lt.s32.totalorder %v1061_v18, 1024  ;;  %p2016_p9 = pnand %p2015_p8, %p2009_p3 }
 0x15c   : > { %v1315_v59 = vsel %vm1123_vm11, %v2442_v1, 0.0  ;;  %v1063_v14 = vadd.s32 %v2246_v43, %v998_v19  ;;  %vm1126_vm14 = vcmp.lt.s32.totalorder %v1062_v30, 1024  ;;  %v1001_v13 = vadd.s32 384, %v2242_v41 }
 0x15d   : > { %v1508_v20 = vadd.f32 %v1507_v29, %v1445_v25  ;;  %v1376_v35 = vadd.f32 %v1375_v48, %v1313_v58  ;;  %v1316_v61 = vsel %vm1124_vm12, %v2404_v27, 0.0  ;;  %v1064_v46 = vadd.s32 %v2246_v43, %v999_v42 }
 0x15e   : > { %v1448_v62 = vmul.f32 %v1315_v59, %v1315_v59  ;;  %v1065_v0 = vadd.s32 %v2246_v43, %v1000_v55  ;;  %v1317_v2 = vsel %vm1125_vm13, %v2439_v16, 0.0  ;;  %v1318_v1 = vsel %vm1126_vm14, %v2489_v53, 0.0 }
 0x15f   : > { %v1377_v47 = vadd.f32 %v1376_v35, %v1314_v12  ;;  %v1509_v39 = vadd.f32 %v1508_v20, %v1446_v40  ;;  %vm1127_vm15 = vcmp.lt.s32.totalorder %v1063_v14, 1024  ;;  %v1002_v34 = vadd.s32 392, %v2242_v41 }
 0x160   : > { %v1449_v33 = vmul.f32 %v1316_v61, %v1316_v61  ;;  %v1066_v3 = vadd.s32 %v2246_v43, %v1001_v13  ;;  %vm1128_vm0 = vcmp.lt.s32.totalorder %v1064_v46, 1024  ;;  %v1003_v27 = vadd.s32 400, %v2242_v41 }
 0x161   : > { %v1510_v6 = vadd.f32 %v1509_v39, %v1447_v37  ;;  %v1378_v4 = vadd.f32 %v1377_v47, %v1315_v59  ;;  %v1004_v8 = vadd.s32 408, %v2242_v41  ;;  %v1450_v26 = vmul.f32 %v1317_v2, %v1317_v2 }
 0x162   : > { %v1451_v10 = vmul.f32 %v1318_v1, %v1318_v1  ;;  %vm1129_vm1 = vcmp.lt.s32.totalorder %v1065_v0, 1024  ;;  %v1319_v16 = vsel %vm1127_vm15, %v2495_v60, 0.0  ;;  %v1067_v53 = vadd.s32 %v2246_v43, %v1002_v34 }
 0x163   : > { %v1379_v45 = vadd.f32 %v1378_v4, %v1316_v61  ;;  %v1511_v21 = vadd.f32 %v1510_v6, %v1448_v62  ;;  %vm1130_vm2 = vcmp.lt.s32.totalorder %v1066_v3, 1024  ;;  %v1005_v52 = vadd.s32 416, %v2242_v41 }
 0x164   : > { %v1320_v18 = vsel %vm1128_vm0, %v2484_v50, 0.0  ;;  %v1068_v58 = vadd.s32 %v2246_v43, %v1003_v27  ;;  %v1452_v25 = vmul.f32 %v1319_v16, %v1319_v16  ;;  %v1069_v48 = vadd.s32 %v2246_v43, %v1004_v8 }
 0x165   : > { %v1512_v22 = vadd.f32 %v1511_v21, %v1449_v33  ;;  %v1380_v9 = vadd.f32 %v1379_v45, %v1317_v2  ;;  %v1321_v29 = vsel %vm1129_vm1, %v2492_v57, 0.0  ;;  %v1322_v60 = vsel %vm1130_vm2, %v2543_v24, 0.0 }
 0x166   : > { %vm1131_vm3 = vcmp.lt.s32.totalorder %v1067_v53, 1024  ;;  %v1006_v30 = vadd.s32 424, %v2242_v41  ;;  %v1453_v42 = vmul.f32 %v1320_v18, %v1320_v18  ;;  %v1070_v20 = vadd.s32 %v2246_v43, %v1005_v52 }
 0x167   : > { %v1381_v11 = vadd.f32 %v1380_v9, %v1318_v1  ;;  %v1513_v17 = vadd.f32 %v1512_v22, %v1450_v26  ;;  %vm1132_vm4 = vcmp.lt.s32.totalorder %v1068_v58, 1024  ;;  %v1007_v50 = vadd.s32 432, %v2242_v41 }
 0x168   : > { %v1008_v35 = vadd.s32 440, %v2242_v41  ;;  %v1454_v37 = vmul.f32 %v1321_v29, %v1321_v29  ;;  %v1455_v47 = vmul.f32 %v1322_v60, %v1322_v60  ;;  %vm1133_vm5 = vcmp.lt.s32.totalorder %v1069_v48, 1024 }
 0x169   : > { %v1514_v12 = vadd.f32 %v1513_v17, %v1451_v10  ;;  %v1382_v19 = vadd.f32 %v1381_v11, %v1319_v16  ;;  %v1323_v57 = vsel %vm1131_vm3, %v2549_v49, 0.0  ;;  %v1071_v24 = vadd.s32 %v2246_v43, %v1006_v30 }
 0x16a   : > { %vm1134_vm6 = vcmp.lt.s32.totalorder %v1070_v20, 1024  ;;  %v1009_v61 = vadd.s32 448, %v2242_v41  ;;  %v1324_v46 = vsel %vm1132_vm4, %v2540_v15, 0.0  ;;  %v1072_v6 = vadd.s32 %v2246_v43, %v1007_v50 }
 0x16b   : > { %v1383_v55 = vadd.f32 %v1382_v19, %v1320_v18  ;;  %v1515_v40 = vadd.f32 %v1514_v12, %v1452_v25  ;;  %v1456_v0 = vmul.f32 %v1323_v57, %v1323_v57  ;;  %v1073_v2 = vadd.s32 %v2246_v43, %v1008_v35 }
 0x16c   : > { %v1325_v1 = vsel %vm1133_vm5, %v2546_v44, 0.0  ;;  %v1326_v49 = vsel %vm1134_vm6, %v2595_v38, 0.0  ;;  %vm1135_vm7 = vcmp.lt.s32.totalorder %v1071_v24, 1024  ;;  %v1010_v34 = vadd.s32 456, %v2242_v41 }
 0x16d   : > { %v1516_v59 = vadd.f32 %v1515_v40, %v1453_v42  ;;  %v1384_v14 = vadd.f32 %v1383_v55, %v1321_v29  ;;  %v1457_v33 = vmul.f32 %v1324_v46, %v1324_v46  ;;  %v1074_v3 = vadd.s32 %v2246_v43, %v1009_v61 }
 0x16e   : > { %vm1136_vm8 = vcmp.lt.s32.totalorder %v1072_v6, 1024  ;;  %v1011_v15 = vadd.s32 464, %v2242_v41  ;;  %v1012_v27 = vadd.s32 472, %v2242_v41  ;;  %v1458_v8 = vmul.f32 %v1325_v1, %v1325_v1 }
 0x16f   : > { %v1385_v39 = vadd.f32 %v1384_v14, %v1322_v60  ;;  %v1517_v13 = vadd.f32 %v1516_v59, %v1454_v37  ;;  %v1459_v9 = vmul.f32 %v1326_v49, %v1326_v49  ;;  %vm1137_vm9 = vcmp.lt.s32.totalorder %v1073_v2, 1024 }
 0x170   : > { %v1327_v44 = vsel %vm1135_vm7, %v2602_v54, 0.0  ;;  %v1075_v38 = vadd.s32 %v2246_v43, %v1010_v34  ;;  %vm1138_vm10 = vcmp.lt.s32.totalorder %v1074_v3, 1024  ;;  %v1013_v53 = vadd.s32 480, %v2242_v41 }
 0x171   : > { %v1518_v4 = vadd.f32 %v1517_v13, %v1455_v47  ;;  %v1386_v62 = vadd.f32 %v1385_v39, %v1323_v57  ;;  %v1328_v11 = vsel %vm1136_vm8, %v2592_v32, 0.0  ;;  %v1076_v17 = vadd.s32 %v2246_v43, %v1011_v15 }
 0x172   : > { %v1460_v58 = vmul.f32 %v1327_v44, %v1327_v44  ;;  %v1077_v12 = vadd.s32 %v2246_v43, %v1012_v27  ;;  %v1329_v19 = vsel %vm1137_vm9, %v2598_v51, 0.0  ;;  %v1330_v54 = vsel %vm1138_vm10, %v2643_v31, 0.0 }
 0x173   : > { %v1387_v45 = vadd.f32 %v1386_v62, %v1324_v46  ;;  %v1519_v21 = vadd.f32 %v1518_v4, %v1456_v0  ;;  %vm1139_vm11 = vcmp.lt.s32.totalorder %v1075_v38, 1024  ;;  %v1014_v25 = vadd.s32 488, %v2242_v41 }
 0x174   : > { %v1461_v48 = vmul.f32 %v1328_v11, %v1328_v11  ;;  %v1078_v30 = vadd.s32 %v2246_v43, %v1013_v53  ;;  %vm1140_vm12 = vcmp.lt.s32.totalorder %v1076_v17, 1024  ;;  %v1015_v32 = vadd.s32 496, %v2242_v41 }
 0x175   : > { %v1520_v26 = vadd.f32 %v1519_v21, %v1457_v33  ;;  %v1388_v22 = vadd.f32 %v1387_v45, %v1325_v1  ;;  %v1462_v42 = vmul.f32 %v1329_v19, %v1329_v19  ;;  %v1463_v20 = vmul.f32 %v1330_v54, %v1330_v54 }
 0x176   : > { %vm1141_vm13 = vcmp.lt.s32.totalorder %v1077_v12, 1024  ;;  %v1331_v51 = vsel %vm1139_vm11, %v2650_v28, 0.0  ;;  %v1016_v31 = vadd.s32 504, %v2242_v41  ;;  %vm1142_vm14 = vcmp.lt.s32.totalorder %v1078_v30, 1024 }
 0x177   : > { %v1389_v10 = vadd.f32 %v1388_v22, %v1326_v49  ;;  %v1521_v16 = vadd.f32 %v1520_v26, %v1458_v8  ;;  %v1079_v37 = vadd.s32 %v2246_v43, %v1014_v25  ;;  %v1332_v59 = vsel %vm1140_vm12, %v2640_v36, 0.0 }
 0x178   : > { %v1080_v14 = vadd.s32 %v2246_v43, %v1015_v32  ;;  %v1464_v24 = vmul.f32 %v1331_v51, %v1331_v51  ;;  %v1333_v39 = vsel %vm1141_vm13, %v2646_v63, 0.0  ;;  %v1334_v13 = vsel %vm1142_vm14, %v2694_v5, 0.0 }
 0x179   : > { %v1522_v52 = vadd.f32 %v1521_v16, %v1459_v9  ;;  %v1390_v18 = vadd.f32 %v1389_v10, %v1327_v44  ;;  %v1081_v28 = vadd.s32 %v2246_v43, %v1016_v31  ;;  %v1465_v61 = vmul.f32 %v1332_v59, %v1332_v59 }
 0x17a   : > { %vm1143_vm15 = vcmp.lt.s32.totalorder %v1079_v37, 1024  ;;  %vm1144_vm0 = vcmp.lt.s32.totalorder %v1080_v14, 1024  ;;  %v1466_v6 = vmul.f32 %v1333_v39, %v1333_v39  ;;  %v1467_v36 = vmul.f32 %v1334_v13, %v1334_v13 }
 0x17b   : > { %v1391_v29 = vadd.f32 %v1390_v18, %v1328_v11  ;;  %v1523_v60 = vadd.f32 %v1522_v52, %v1460_v58  ;;  %v1335_v0 = vsel %vm1143_vm15, %v2707_v7, 0.0  ;;  %vm1145_vm1 = vcmp.lt.s32.totalorder %v1081_v28, 1024 }
 0x17c   : > { %v1336_v63 = vsel %vm1144_vm0, %v2691_v23, 0.0  ;;  %v1468_v43 = vmul.f32 %v1335_v0, %v1335_v0  ;;  %v1337_v34 = vsel %vm1145_vm1, %v2697_v56, 0.0  ;;  %vm1540_vm2 = vcmask 1040384  }
 0x17d   : > { %v1524_v55 = vadd.f32 %v1523_v60, %v1461_v48  ;;  %v1392_v40 = vadd.f32 %v1391_v29, %v1329_v19  ;;  %v1469_v33 = vmul.f32 %v1336_v63, %v1336_v63  ;;  %v1470_v3 = vmul.f32 %v1337_v34, %v1337_v34 }
 0x17e   : > { %vm1542_vm3 = vcmask 1041408  }
 0x17f   : > { %v1393_v50 = vadd.f32 %v1392_v40, %v1330_v54  ;;  %v1525_v35 = vadd.f32 %v1524_v55, %v1462_v42 }
 0x181   : > { %v1526_v47 = vadd.f32 %v1525_v35, %v1463_v20  ;;  %v1394_v57 = vadd.f32 %v1393_v50, %v1331_v51 }
 0x183   : > { %v1395_v41 = vadd.f32 %v1394_v57, %v1332_v59  ;;  %v1527_v46 = vadd.f32 %v1526_v47, %v1464_v24 }
 0x185   : > { %v1528_v4 = vadd.f32 %v1527_v46, %v1465_v61  ;;  %v1396_v62 = vadd.f32 %v1395_v41, %v1333_v39 }
 0x187   : > { %v1397_v2 = vadd.f32 %v1396_v62, %v1334_v13  ;;  %v1529_v1 = vadd.f32 %v1528_v4, %v1466_v6 }
 0x189   : > { %v1530_v49 = vadd.f32 %v1529_v1, %v1467_v36  ;;  %v1398_v5 = vadd.f32 %v1397_v2, %v1335_v0 }
 0x18b   : > { %v1399_v45 = vadd.f32 %v1398_v5, %v1336_v63  ;;  %v1531_v21 = vadd.f32 %v1530_v49, %v1468_v43 }
 0x18d   : > { %v1400_v15 = vadd.f32 %v1399_v45, %v1337_v34  ;;  %v1532_v27 = vadd.f32 %v1531_v21, %v1469_v33 }
 0x18f   : > { %v1401_v8 = vrot.slane %v1400_v15, 4  ;;  %v1533_v7 = vadd.f32 %v1532_v27, %v1470_v3 }
 0x191   : > { %v1402_v26 = vadd.f32 %v1401_v8, %v1400_v15  ;;  %v1534_v22 = vrot.slane %v1533_v7, 4 }
 0x193   : > { %v1403_v9 = vrot.slane %v1402_v26, 2  ;;  %v1535_v44 = vadd.f32 %v1534_v22, %v1533_v7 }
 0x195   : > { %v1404_v23 = vadd.f32 %v1403_v9, %v1402_v26  ;;  %v1536_v38 = vrot.slane %v1535_v44, 2 }
 0x197   : > { %v1405_v10 = vrot.slane %v1404_v23, 1  ;;  %v1537_v16 = vadd.f32 %v1536_v38, %v1535_v44 }
 0x199   : > { %v1538_v56 = vrot.slane %v1537_v16, 1  ;;  %v1406_v53 = vadd.f32 %v1405_v10, %v1404_v23 }
 0x19b   : > { %v1539_v11 = vadd.f32 %v1538_v56, %v1537_v16 }
 0x19d   : > { %v1541_v17 = vsel %vm1540_vm2, %v1406_v53, %v1539_v11 }
 0x19e   : > { %v1543_v52 = vsel %vm1542_vm3, %v1541_v17, 0.0 }
 0x19f   : > { %1544 = vst [vmem:[%s202_s13] sm:$0xff] %v1543_v52 }
 0x1a0   : > { %2019 = shalt.err (!%p2016_p9)
}
 0x1a1   : > { %s2020_s30 = scalar_lea.hbm %s2839_s23, 128  ;;  %s2024_s8 = scalar_lea.hbm %s2886_s4, 256 }
 0x1a2   : > { %p2021_p10 = scmp.ne.s32.totalorder %s2839_s23, %s2020_s30  ;;  %p2025_p13 = scmp.lt.u32.totalorder %s2839_s23, %s2886_s4 }
 0x1a3   : > { %p2026_p0 = scmp.lt.u32.totalorder %s2024_s8, %s2020_s30  ;;  %p2028_p2 = scmp.lt.u32.totalorder %s2020_s30, %s2839_s23 }
 0x1a4   : > { %p2022_p11 = pnand %p2021_p10, %p2141_p5 }
 0x1a5   : > { %p2027_p1 = por %p2026_p0, %p2025_p13 }
 0x1a6   : > { %p2023_p12 = pneg %p2022_p11 }
 0x1a7   : > { %p2029_p3 = por %p2028_p2, %p2027_p1 }
 0x1a9   : > { %p2030_p4 = pnand %p2029_p3, %p2023_p12 }
 0x1ab   : > { %2033 = shalt.err (!%p2030_p4)
}
 0x1ac   : > { %1894 = dma.vmem_to_hbm [thread:$0]  (%p2141_p5), %s2841_s14, 128, %s2839_s23, %s1551_s27  }
 0x1ad PF: > { %p1904_p7 = scmp.ge.s32.totalorder %s2072_s18, 2  ;;  %s1592_s10 = sand.u32 1, %s2060_s15  }
 0x1ae   : > { %s1593_s12 = scalar_lea.sflag [#allocation3], %s1592_s10 }
 0x1af   : > { %p1898_p8 = pnand %p1904_p7, %p2145_p6 }
 0x1b1   : > { %2051 = dma.done.wait (!%p1898_p8), %s1593_s12, 8192  }
 0x1b2   : > { %2053 = vsyncadd (!%p1898_p8), %s1593_s12, 4294959104  ;;  %s1602_s13 = scalar_lea.sflag [#allocation5], %s1592_s10 }
 0x1b3   : > { %2055 = dma.done.wait (!%p1898_p8), %s1602_s13, 128  }
 0x1b4   : > { %2057 = vsyncadd (!%p1898_p8), %s1602_s13, 4294967168  ;;  %p18_p5 = scmp.ge.s32.totalorder %s2128_s21, 4   ;;  %s2889_s15 = smov %s2064_s16 }
 0x1b5   : > { %s2890_s16 = smov %s2068_s17  ;;  %s2891_s17 = smov %s2139_s24 }
 0x1b6   : > { %s2892_s18 = smov %s2128_s21  ;;  %20 = sbr.rel (!%p18_p5) target bundleno = 5 (0x5), region = 84 }
 0x1bd   :  { %1607 = vsyncpa [#allocation3], 1 }
 0x1be   :  { %1609 = vsyncpa [#allocation3 + $0x1], 1 }
 0x1bf   :  { %1610 = vsyncpa [#allocation5], 1 }
 0x1c0   :  { %1612 = vsyncpa [#allocation5 + $0x1], 1 }

</bundles_post_ra>
